<compile_context>
chip_gen: v7x
topology: tpu7x:2x2x1
jax: 0.10.0
libtpu: 0.0.40
codegen_flags: <defaults>
</compile_context>

<pallas_src>
import jax
import jax.numpy as jnp
from jax import lax
from jax.experimental import pallas as pl
from jax.experimental.pallas import tpu as pltpu

BN_EPS = 1e-5


def _round_up(x, m):
    return (x + m - 1) // m * m


def _vmem_limit(bytes_needed, floor_mb, cap_mb=48):
    # 2x headroom over computed need, clamped to leave compiler headroom on v7x.
    return int(min(max(2 * bytes_needed, floor_mb * 2**20), cap_mb * 2**20))


# ----------------------------------------------------------------------------
# Kernel 1: conv (im2col matmul, bf16 on the MXU) + bias + partial BN stats
# ----------------------------------------------------------------------------
def _make_conv_stats_kernel(m_valid, tile_m):
    def kernel(p_ref, w_ref, b_ref, z_ref, st_ref):
        # p_ref: [TM, K8] bf16 patches, w_ref: [K8, Cp] bf16, b_ref: [1, Cp] f32
        i = pl.program_id(0)
        z = jnp.dot(p_ref[...], w_ref[...], preferred_element_type=jnp.float32)
        z = z + b_ref[...]
        z_ref[...] = z.astype(z_ref.dtype)          # bf16 intermediate to HBM

        cp = z.shape[1]
        rid = lax.broadcasted_iota(jnp.int32, (8, cp), 0)

        def put_stats(s, sq):
            st_ref[...] = jnp.where(rid == 0, s, jnp.where(rid == 1, sq, 0.0))

        last = pl.num_programs(0) - 1

        # All tiles except the last are fully valid: skip the row-mask VPU work.
        @pl.when(i < last)
        def _():
            put_stats(jnp.sum(z, axis=0, keepdims=True),
                      jnp.sum(z * z, axis=0, keepdims=True))

        # Last tile: padding rows must not pollute the BN statistics.
        @pl.when(i == last)
        def _():
            rows = i * tile_m + lax.broadcasted_iota(jnp.int32, (tile_m, cp), 0)
            zm = jnp.where(rows < m_valid, z, 0.0)
            put_stats(jnp.sum(zm, axis=0, keepdims=True),
                      jnp.sum(zm * zm, axis=0, keepdims=True))

    return kernel


# ----------------------------------------------------------------------------
# Kernel 2: per-image BN-apply + ReLU + 3x3/stride-2/pad-1 max-pool (fused)
# ----------------------------------------------------------------------------
def _make_bn_relu_pool_kernel(ho, wo, hp, wp, cp):
    # Structure per pooled row i:
    #   1) contiguous slab load of activation rows 2i, 2i+1 (+ masked halo 2i-1),
    #      normalize + ReLU, vertical 3-tap max        -> vrow (Wo, Cp)
    #   2) aligned store of vrow at sublane offset 8 into a zero-left-padded row
    #      buffer, then 3 stride-2 taps                 -> out row (Wp, Cp)
    # Zero is a valid pool-padding value ONLY because the activation is
    # post-ReLU (>= 0); keep this invariant if the activation ever changes.
    assert ho % 2 == 0 and wo % 2 == 0 and wo % 8 == 0
    pad = 8                                    # sublane-aligned left border

    def kernel(z_ref, scale_ref, shift_ref, o_ref, vbuf_ref):
        # Zero the left border every grid step (megacore-safe).
        vbuf_ref[0:pad, :] = jnp.zeros((pad, cp), jnp.float32)

        scale = scale_ref[...]                 # (1, Cp)
        shift = shift_ref[...]

        def pool_row(i, carry):
            # activation rows 2i, 2i+1: one contiguous 2*Wo slab.
            base = pl.multiple_of(2 * i * wo, 2 * wo)
            mb = z_ref[pl.ds(base, 2 * wo), :].astype(jnp.float32)
            y_mb = jnp.maximum(mb * scale + shift, 0.0)
            # top halo row 2i-1: clamp to row 0 and mask out when i == 0.
            rt = pl.multiple_of(jnp.maximum(2 * i - 1, 0) * wo, wo)
            t = z_ref[pl.ds(rt, wo), :].astype(jnp.float32)
            y_t = jnp.maximum(t * scale + shift, 0.0) * (i > 0).astype(jnp.float32)

            vrow = jnp.maximum(y_t, jnp.maximum(y_mb[0:wo, :], y_mb[wo:2 * wo, :]))
            vbuf_ref[pl.ds(pad, wo), :] = vrow              # aligned store

            left = vbuf_ref[pl.ds(pad - 1, wp, 2), :]       # cols 2j-1
            mid = vbuf_ref[pl.ds(pad, wp, 2), :]            # cols 2j
            right = vbuf_ref[pl.ds(pad + 1, wp, 2), :]      # cols 2j+1
            o_ref[i] = jnp.maximum(left, jnp.maximum(mid, right))
            return carry

        lax.fori_loop(0, hp, pool_row, 0)

    return kernel


# ------------------------------- JAX glue -----------------------------------
def _im2col(x_nhwc, kh, kw, stride, pad):
    N, H, W, C = x_nhwc.shape
    xp = jnp.pad(x_nhwc, ((0, 0), (pad, pad), (pad, pad), (0, 0)))
    Ho = (H + 2 * pad - kh) // stride + 1
    Wo = (W + 2 * pad - kw) // stride + 1
    taps = []
    for ky in range(kh):
        for kx in range(kw):
            taps.append(xp[:, ky:ky + stride * Ho:stride,
                            kx:kx + stride * Wo:stride, :])
    patches = jnp.stack(taps, axis=3)                 # [N, Ho, Wo, kh*kw, C]
    return patches.reshape(N * Ho * Wo, kh * kw * C), Ho, Wo


@jax.jit
def resnet_stem_block(x_nchw, params):
    w, b, gamma, beta = params["w"], params["b"], params["gamma"], params["beta"]
    N, Cin, H, W = x_nchw.shape
    Cout = w.shape[-1]
    # NCHW -> NHWC, bf16 *before* im2col so the XLA patch intermediate is bf16.
    # (bf16 conv inputs vs. the f32-HIGHEST reference: fine for a stem layer,
    #  error grows ~sqrt(K); covered by the tolerance below.)
    x = jnp.transpose(x_nchw, (0, 2, 3, 1)).astype(jnp.bfloat16)

    patches, Ho, Wo = _im2col(x, 7, 7, 2, 3)
    M, K = patches.shape
    HoWo = Ho * Wo
    assert Ho % 2 == 0 and Wo % 2 == 0 and Wo % 8 == 0, (Ho, Wo)

    Cp = _round_up(Cout, 128)           # lane-dense channel dim (output lanes)
    K8 = _round_up(K, 8)                # do NOT pad K to 128 (full-dim block)
    TM = min(2048, _round_up(M, 8))     # large row tile to amortize step overhead
    Mp = _round_up(M, TM)
    nT = Mp // TM

    patches_p = jnp.pad(patches, ((0, Mp - M), (0, K8 - K)))          # bf16
    w2d = jnp.pad(w.reshape(K, Cout).astype(jnp.bfloat16),
                  ((0, K8 - K), (0, Cp - Cout)))
    b2d = jnp.pad(b, (0, Cp - Cout)).reshape(1, Cp).astype(jnp.float32)

    # ---- pass 1: conv + bias + per-tile BN partial statistics ----
    p1_need = (2 * (TM * K8 * 2 + K8 * Cp * 2 + Cp * 4 + TM * Cp * 2 + 8 * Cp * 4)
               + 3 * TM * Cp * 4)       # + in-kernel f32 temporaries
    z, stats = pl.pallas_call(
        _make_conv_stats_kernel(M, TM),
        out_shape=(jax.ShapeDtypeStruct((Mp, Cp), jnp.bfloat16),
                   jax.ShapeDtypeStruct((nT * 8, Cp), jnp.float32)),
        grid=(nT,),
        in_specs=[
            pl.BlockSpec((TM, K8), lambda i: (i, 0)),
            pl.BlockSpec((K8, Cp), lambda i: (0, 0)),
            pl.BlockSpec((1, Cp), lambda i: (0, 0)),
        ],
        out_specs=[
            pl.BlockSpec((TM, Cp), lambda i: (i, 0)),
            pl.BlockSpec((8, Cp), lambda i: (i, 0)),
        ],
        compiler_params=pltpu.CompilerParams(
            dimension_semantics=("parallel",),
            vmem_limit_bytes=_vmem_limit(p1_need, floor_mb=32)),
    )(patches_p, w2d, b2d)

    # ---- BN(train) finalize (tiny per-channel math in XLA) ----
    # NOTE: E[x^2]-E[x]^2 in f32 can cancel when |mean| >> std; acceptable for
    # a stem layer, use a Welford merge if reused elsewhere.
    st = stats.reshape(nT, 8, Cp)
    ch_sum = jnp.sum(st[:, 0, :], axis=0)
    ch_sq = jnp.sum(st[:, 1, :], axis=0)
    mean = ch_sum / M
    var = ch_sq / M - mean * mean                     # biased variance
    gamma_p = jnp.pad(gamma, (0, Cp - Cout))
    beta_p = jnp.pad(beta, (0, Cp - Cout))
    inv = lax.rsqrt(var + BN_EPS)
    scale = (gamma_p * inv).reshape(1, Cp).astype(jnp.float32)
    shift = (beta_p - mean * gamma_p * inv).reshape(1, Cp).astype(jnp.float32)

    Hp = (Ho + 2 - 3) // 2 + 1
    Wp = (Wo + 2 - 3) // 2 + 1

    # ---- pass 2: fused normalize + ReLU + max-pool, one image per grid step ----
    p2_need = (2 * (HoWo * Cp * 2 + Hp * Wp * Cp * 4 + 2 * Cp * 4)
               + (8 + Wo) * Cp * 4 + 4 * 2 * Wo * Cp * 4)
    pooled = pl.pallas_call(
        _make_bn_relu_pool_kernel(Ho, Wo, Hp, Wp, Cp),
        out_shape=jax.ShapeDtypeStruct((N * Hp, Wp, Cp), jnp.float32),
        grid=(N,),
        in_specs=[
            pl.BlockSpec((HoWo, Cp), lambda n: (n, 0)),
            pl.BlockSpec((1, Cp), lambda n: (0, 0)),
            pl.BlockSpec((1, Cp), lambda n: (0, 0)),
        ],
        out_specs=pl.BlockSpec((Hp, Wp, Cp), lambda n: (n, 0, 0)),
        scratch_shapes=[pltpu.VMEM((8 + Wo, Cp), jnp.float32)],
        compiler_params=pltpu.CompilerParams(
            dimension_semantics=("parallel",),
            vmem_limit_bytes=_vmem_limit(p2_need, floor_mb=16)),
    )(z, scale, shift)

    # Layout plumbing back to the PyTorch contract (NCHW, Cout channels).
    # A downstream consumer that accepts NHWC/Cp could skip this slice+transpose.
    out = pooled.reshape(N, Hp, Wp, Cp)[:, :, :, :Cout]
    return jnp.transpose(out, (0, 3, 1, 2))           # back to NCHW


# ---------------------------- pure-JAX reference ----------------------------
def reference(x_nchw, params):
    w, b, gamma, beta = params["w"], params["b"], params["gamma"], params["beta"]
    w_oihw = jnp.transpose(w, (3, 2, 0, 1))           # [Cout, Cin, 7, 7]
    z = lax.conv_general_dilated(
        x_nchw.astype(jnp.float32), w_oihw,
        window_strides=(2, 2), padding=((3, 3), (3, 3)),
        dimension_numbers=("NCHW", "OIHW", "NCHW"),
        precision=lax.Precision.HIGHEST)
    z = z + b[None, :, None, None]
    mean = jnp.mean(z, axis=(0, 2, 3), keepdims=True)
    var = jnp.mean((z - mean) ** 2, axis=(0, 2, 3), keepdims=True)
    y = (z - mean) * lax.rsqrt(var + BN_EPS) * gamma[None, :, None, None] \
        + beta[None, :, None, None]
    y = jnp.maximum(y, 0.0)
    return lax.reduce_window(
        y, -jnp.inf, lax.max, (1, 1, 3, 3), (1, 1, 2, 2),
        padding=((0, 0), (0, 0), (1, 1), (1, 1)))


# --------------------------------- main -------------------------------------
if __name__ == "__main__":
    key = jax.random.PRNGKey(0)
    k_x, k_w, k_b, k_g, k_be = jax.random.split(key, 5)

    N, Cin, H, W = 2, 4, 16, 16
    Cout = 8

    x = jax.random.normal(k_x, (N, Cin, H, W), jnp.float32)
    params = {
        "w": 0.05 * jax.random.normal(k_w, (7, 7, Cin, Cout), jnp.float32),
        "b": 0.05 * jax.random.normal(k_b, (Cout,), jnp.float32),
        "gamma": 1.0 + 0.1 * jax.random.normal(k_g, (Cout,), jnp.float32),
        "beta": 0.1 * jax.random.normal(k_be, (Cout,), jnp.float32),
    }

    out = jax.block_until_ready(resnet_stem_block(x, params))
    ref = jax.block_until_ready(reference(x, params))

    assert out.shape == (N, Cout, H // 4, W // 4), out.shape
    err = float(jnp.max(jnp.abs(out - ref)))
    if err > 5e-2:
        raise AssertionError(f"mismatch vs reference: max abs err {err}")
    print("KERNEL_OK")
</pallas_src>

<mosaic_0001>
module attributes {stable_mosaic.version = 11 : i64} {
  func.func @kernel(%arg0: i32, %arg1: memref<64x128xbf16, #tpu.memory_space<vmem>>, %arg2: memref<1x128xf32, #tpu.memory_space<vmem>>, %arg3: memref<1x128xf32, #tpu.memory_space<vmem>>, %arg4: memref<4x4x128xf32, #tpu.memory_space<vmem>>, %arg5: memref<16x128xf32, #tpu.memory_space<vmem>>) attributes {dimension_semantics = [#tpu.dimension_semantics<parallel>], iteration_bounds = array<i64: 2>, scalar_prefetch = 0 : i64, scratch_operands = 1 : i64, tpu.core_type = #tpu.core_type<tc>, window_params = [{transform_indices = @transform_0, window_bounds = array<i64: 64, 128>}, {pipeline_mode = #tpu.pipeline_mode<synchronous>, transform_indices = @transform_1, window_bounds = array<i64: 1, 128>}, {pipeline_mode = #tpu.pipeline_mode<synchronous>, transform_indices = @transform_2, window_bounds = array<i64: 1, 128>}, {transform_indices = @transform_3, window_bounds = array<i64: 4, 4, 128>}]} {
    %cst = arith.constant 0.000000e+00 : f32
    %0 = vector.broadcast %cst : f32 to vector<8x128xf32>
    %c0 = arith.constant 0 : index
    %c0_0 = arith.constant 0 : index
    %1 = vector.load %arg5[%c0, %c0_0] : memref<16x128xf32, #tpu.memory_space<vmem>>, vector<8x128xf32>
    tpu.vector_store %arg5[%c0, %c0_0], %0 {strides = array<i32>} : memref<16x128xf32, #tpu.memory_space<vmem>>, vector<8x128xf32>,
    %c0_1 = arith.constant 0 : index
    %c0_2 = arith.constant 0 : index
    %2 = vector.load %arg2[%c0_1, %c0_2] : memref<1x128xf32, #tpu.memory_space<vmem>>, vector<1x128xf32>
    %c0_3 = arith.constant 0 : index
    %c0_4 = arith.constant 0 : index
    %3 = vector.load %arg3[%c0_3, %c0_4] : memref<1x128xf32, #tpu.memory_space<vmem>>, vector<1x128xf32>
    %c0_i32 = arith.constant 0 : i32
    %c4_i32 = arith.constant 4 : i32
    %4 = arith.addi %c0_i32, %c4_i32 : i32
    %c1_i32 = arith.constant 1 : i32
    scf.for %arg6 = %c0_i32 to %4 step %c1_i32  : i32 {
      %c2_i32 = arith.constant 2 : i32
      %5 = arith.muli %c2_i32, %arg6 : i32
      %c8_i32 = arith.constant 8 : i32
      %6 = arith.muli %5, %c8_i32 : i32
      %7 = tpu.assume_multiple %6, 16 : i32
      %8 = arith.index_cast %7 : i32 to index
      %c0_6 = arith.constant 0 : index
      %9 = vector.load %arg1[%8, %c0_6] : memref<64x128xbf16, #tpu.memory_space<vmem>>, vector<16x128xbf16>
      %10 = arith.extf %9 : vector<16x128xbf16> to vector<16x128xf32>
      %11 = vector.broadcast %2 : vector<1x128xf32> to vector<16x128xf32>
      %12 = arith.mulf %10, %11 : vector<16x128xf32>
      %13 = vector.broadcast %3 : vector<1x128xf32> to vector<16x128xf32>
      %14 = arith.addf %12, %13 : vector<16x128xf32>
      %cst_7 = arith.constant 0.000000e+00 : f32
      %15 = vector.broadcast %cst_7 : f32 to vector<16x128xf32>
      %16 = arith.maximumf %14, %15 : vector<16x128xf32>
      %c2_i32_8 = arith.constant 2 : i32
      %17 = arith.muli %c2_i32_8, %arg6 : i32
      %c1_i32_9 = arith.constant 1 : i32
      %18 = arith.subi %17, %c1_i32_9 : i32
      %c0_i32_10 = arith.constant 0 : i32
      %19 = arith.maxsi %18, %c0_i32_10 : i32
      %c8_i32_11 = arith.constant 8 : i32
      %20 = arith.muli %19, %c8_i32_11 : i32
      %21 = tpu.assume_multiple %20, 8 : i32
      %22 = arith.index_cast %21 : i32 to index
      %c0_12 = arith.constant 0 : index
      %23 = vector.load %arg1[%22, %c0_12] : memref<64x128xbf16, #tpu.memory_space<vmem>>, vector<8x128xbf16>
      %24 = arith.extf %23 : vector<8x128xbf16> to vector<8x128xf32>
      %25 = vector.broadcast %2 : vector<1x128xf32> to vector<8x128xf32>
      %26 = arith.mulf %24, %25 : vector<8x128xf32>
      %27 = vector.broadcast %3 : vector<1x128xf32> to vector<8x128xf32>
      %28 = arith.addf %26, %27 : vector<8x128xf32>
      %cst_13 = arith.constant 0.000000e+00 : f32
      %29 = vector.broadcast %cst_13 : f32 to vector<8x128xf32>
      %30 = arith.maximumf %28, %29 : vector<8x128xf32>
      %c0_i32_14 = arith.constant 0 : i32
      %31 = arith.cmpi sgt, %arg6, %c0_i32_14 : i32
      %32 = arith.extui %31 : i1 to i32
      %33 = arith.sitofp %32 : i32 to f32
      %34 = vector.broadcast %33 : f32 to vector<8x128xf32>
      %35 = arith.mulf %30, %34 : vector<8x128xf32>
      %36 = vector.extract_strided_slice %16 {offsets = [0, 0], sizes = [8, 128], strides = [1, 1]} : vector<16x128xf32> to vector<8x128xf32>
      %37 = vector.extract_strided_slice %16 {offsets = [8, 0], sizes = [8, 128], strides = [1, 1]} : vector<16x128xf32> to vector<8x128xf32>
      %38 = arith.maximumf %36, %37 : vector<8x128xf32>
      %39 = arith.maximumf %35, %38 : vector<8x128xf32>
      %c8 = arith.constant 8 : index
      %c0_15 = arith.constant 0 : index
      %40 = vector.load %arg5[%c8, %c0_15] : memref<16x128xf32, #tpu.memory_space<vmem>>, vector<8x128xf32>
      tpu.vector_store %arg5[%c8, %c0_15], %39 {strides = array<i32>} : memref<16x128xf32, #tpu.memory_space<vmem>>, vector<8x128xf32>,
      %c7 = arith.constant 7 : index
      %c0_16 = arith.constant 0 : index
      %41 = tpu.strided_load %arg5[%c7, %c0_16] {strides = array<i32: 2, 1>} : memref<16x128xf32, #tpu.memory_space<vmem>>, vector<4x128xf32>
      %c8_17 = arith.constant 8 : index
      %c0_18 = arith.constant 0 : index
      %42 = tpu.strided_load %arg5[%c8_17, %c0_18] {strides = array<i32: 2, 1>} : memref<16x128xf32, #tpu.memory_space<vmem>>, vector<4x128xf32>
      %c9 = arith.constant 9 : index
      %c0_19 = arith.constant 0 : index
      %43 = tpu.strided_load %arg5[%c9, %c0_19] {strides = array<i32: 2, 1>} : memref<16x128xf32, #tpu.memory_space<vmem>>, vector<4x128xf32>
      %44 = arith.maximumf %42, %43 : vector<4x128xf32>
      %45 = arith.maximumf %41, %44 : vector<4x128xf32>
      %46 = arith.index_cast %arg6 : i32 to index
      %c0_20 = arith.constant 0 : index
      %c0_21 = arith.constant 0 : index
      %47 = vector.load %arg4[%46, %c0_20, %c0_21] : memref<4x4x128xf32, #tpu.memory_space<vmem>>, vector<1x4x128xf32>
      %48 = vector.shape_cast %47 : vector<1x4x128xf32> to vector<4x128xf32>
      %49 = vector.shape_cast %45 : vector<4x128xf32> to vector<1x4x128xf32>
      tpu.vector_store %arg4[%46, %c0_20, %c0_21], %49 {strides = array<i32>} : memref<4x4x128xf32, #tpu.memory_space<vmem>>, vector<1x4x128xf32>,
    }
    %c4_i32_5 = arith.constant 4 : i32
    return
  }
  func.func @transform_0(%arg0: i32) -> (i32, i32) {
    %c0_i32 = arith.constant 0 : i32
    %c0_i32_0 = arith.constant 0 : i32
    return %arg0, %c0_i32 : i32, i32
  }
  func.func @transform_1(%arg0: i32) -> (i32, i32) {
    %c0_i32 = arith.constant 0 : i32
    %c0_i32_0 = arith.constant 0 : i32
    %c0_i32_1 = arith.constant 0 : i32
    return %c0_i32, %c0_i32_0 : i32, i32
  }
  func.func @transform_2(%arg0: i32) -> (i32, i32) {
    %c0_i32 = arith.constant 0 : i32
    %c0_i32_0 = arith.constant 0 : i32
    %c0_i32_1 = arith.constant 0 : i32
    return %c0_i32, %c0_i32_0 : i32, i32
  }
  func.func @transform_3(%arg0: i32) -> (i32, i32, i32) {
    %c0_i32 = arith.constant 0 : i32
    %c0_i32_0 = arith.constant 0 : i32
    %c0_i32_1 = arith.constant 0 : i32
    return %arg0, %c0_i32, %c0_i32_0 : i32, i32, i32
  }
}

module attributes {stable_mosaic.version = 11 : i64} {
  func.func @kernel(%arg0: i32, %arg1: memref<128x200xbf16, #tpu.memory_space<vmem>>, %arg2: memref<200x128xbf16, #tpu.memory_space<vmem>>, %arg3: memref<1x128xf32, #tpu.memory_space<vmem>>, %arg4: memref<128x128xbf16, #tpu.memory_space<vmem>>, %arg5: memref<8x128xf32, #tpu.memory_space<vmem>>) attributes {dimension_semantics = [#tpu.dimension_semantics<parallel>], iteration_bounds = array<i64: 1>, scalar_prefetch = 0 : i64, scratch_operands = 0 : i64, tpu.core_type = #tpu.core_type<tc>, window_params = [{transform_indices = @transform_0, window_bounds = array<i64: 128, 200>}, {pipeline_mode = #tpu.pipeline_mode<synchronous>, transform_indices = @transform_1, window_bounds = array<i64: 200, 128>}, {pipeline_mode = #tpu.pipeline_mode<synchronous>, transform_indices = @transform_2, window_bounds = array<i64: 1, 128>}, {transform_indices = @transform_3, window_bounds = array<i64: 128, 128>}, {transform_indices = @transform_4, window_bounds = array<i64: 8, 128>}]} {
    %c0 = arith.constant 0 : index
    %c0_0 = arith.constant 0 : index
    %0 = vector.load %arg1[%c0, %c0_0] : memref<128x200xbf16, #tpu.memory_space<vmem>>, vector<128x200xbf16>
    %c0_1 = arith.constant 0 : index
    %c0_2 = arith.constant 0 : index
    %1 = vector.load %arg2[%c0_1, %c0_2] : memref<200x128xbf16, #tpu.memory_space<vmem>>, vector<200x128xbf16>
    %cst = arith.constant dense<0.000000e+00> : vector<128x128xf32>
    %2 = tpu.matmul %0, %1, %cst {dimension_numbers = #tpu.dot_dimension_numbers<[1], [0], [0], [1], [0, 0, 1, 1], [], []>} : vector<128x200xbf16>, vector<200x128xbf16>, vector<128x128xf32> -> vector<128x128xf32>
    %c0_3 = arith.constant 0 : index
    %c0_4 = arith.constant 0 : index
    %3 = vector.load %arg3[%c0_3, %c0_4] : memref<1x128xf32, #tpu.memory_space<vmem>>, vector<1x128xf32>
    %4 = vector.broadcast %3 : vector<1x128xf32> to vector<128x128xf32>
    %5 = arith.addf %2, %4 : vector<128x128xf32>
    %6 = arith.truncf %5 : vector<128x128xf32> to vector<128x128xbf16>
    %c0_5 = arith.constant 0 : index
    %c0_6 = arith.constant 0 : index
    %7 = vector.load %arg4[%c0_5, %c0_6] : memref<128x128xbf16, #tpu.memory_space<vmem>>, vector<128x128xbf16>
    tpu.vector_store %arg4[%c0_5, %c0_6], %6 {strides = array<i32>} : memref<128x128xbf16, #tpu.memory_space<vmem>>, vector<128x128xbf16>,
    %8 = tpu.iota {dimensions = array<i32: 0>} : vector<8x128xi32>
    %c0_i32 = arith.constant 0 : i32
    %9 = arith.cmpi slt, %arg0, %c0_i32 : i32
    %10 = arith.extui %9 : i1 to i32
    %c0_i32_7 = arith.constant 0 : i32
    %11 = arith.cmpi ne, %10, %c0_i32_7 : i32
    scf.if %11 {
      %cst_10 = arith.constant dense<0.000000e+00> : vector<128xf32>
      %15 = vector.multi_reduction <add>, %5, %cst_10 [0] : vector<128x128xf32> to vector<128xf32>
      %16 = vector.shape_cast %15 : vector<128xf32> to vector<1x128xf32>
      %17 = arith.mulf %5, %5 : vector<128x128xf32>
      %cst_11 = arith.constant dense<0.000000e+00> : vector<128xf32>
      %18 = vector.multi_reduction <add>, %17, %cst_11 [0] : vector<128x128xf32> to vector<128xf32>
      %19 = vector.shape_cast %18 : vector<128xf32> to vector<1x128xf32>
      %c0_i32_12 = arith.constant 0 : i32
      %20 = vector.broadcast %c0_i32_12 : i32 to vector<8x128xi32>
      %21 = arith.cmpi eq, %8, %20 : vector<8x128xi32>
      %c1_i32 = arith.constant 1 : i32
      %22 = vector.broadcast %c1_i32 : i32 to vector<8x128xi32>
      %23 = arith.cmpi eq, %8, %22 : vector<8x128xi32>
      %cst_13 = arith.constant 0.000000e+00 : f32
      %24 = vector.shape_cast %19 : vector<1x128xf32> to vector<1x128xf32>
      %25 = vector.broadcast %24 : vector<1x128xf32> to vector<8x128xf32>
      %26 = vector.broadcast %cst_13 : f32 to vector<8x128xf32>
      %27 = arith.select %23, %25, %26 : vector<8x128xi1>, vector<8x128xf32>
      %28 = vector.shape_cast %16 : vector<1x128xf32> to vector<1x128xf32>
      %29 = vector.broadcast %28 : vector<1x128xf32> to vector<8x128xf32>
      %30 = arith.select %21, %29, %27 : vector<8x128xi1>, vector<8x128xf32>
      %c0_14 = arith.constant 0 : index
      %c0_15 = arith.constant 0 : index
      %31 = vector.load %arg5[%c0_14, %c0_15] : memref<8x128xf32, #tpu.memory_space<vmem>>, vector<8x128xf32>
      tpu.vector_store %arg5[%c0_14, %c0_15], %30 {strides = array<i32>} : memref<8x128xf32, #tpu.memory_space<vmem>>, vector<8x128xf32>,
    } else {
    }
    %c0_i32_8 = arith.constant 0 : i32
    %12 = arith.cmpi eq, %arg0, %c0_i32_8 : i32
    %13 = arith.extui %12 : i1 to i32
    %c0_i32_9 = arith.constant 0 : i32
    %14 = arith.cmpi ne, %13, %c0_i32_9 : i32
    scf.if %14 {
      %c128_i32 = arith.constant 128 : i32
      %15 = arith.muli %arg0, %c128_i32 : i32
      %16 = tpu.iota {dimensions = array<i32: 0>} : vector<128x128xi32>
      %17 = vector.broadcast %15 : i32 to vector<128x128xi32>
      %18 = arith.addi %17, %16 : vector<128x128xi32>
      %c128_i32_10 = arith.constant 128 : i32
      %19 = vector.broadcast %c128_i32_10 : i32 to vector<128x128xi32>
      %20 = arith.cmpi slt, %18, %19 : vector<128x128xi32>
      %cst_11 = arith.constant 0.000000e+00 : f32
      %21 = vector.broadcast %cst_11 : f32 to vector<128x128xf32>
      %22 = arith.select %20, %5, %21 : vector<128x128xi1>, vector<128x128xf32>
      %cst_12 = arith.constant dense<0.000000e+00> : vector<128xf32>
      %23 = vector.multi_reduction <add>, %22, %cst_12 [0] : vector<128x128xf32> to vector<128xf32>
      %24 = vector.shape_cast %23 : vector<128xf32> to vector<1x128xf32>
      %25 = arith.mulf %22, %22 : vector<128x128xf32>
      %cst_13 = arith.constant dense<0.000000e+00> : vector<128xf32>
      %26 = vector.multi_reduction <add>, %25, %cst_13 [0] : vector<128x128xf32> to vector<128xf32>
      %27 = vector.shape_cast %26 : vector<128xf32> to vector<1x128xf32>
      %c0_i32_14 = arith.constant 0 : i32
      %28 = vector.broadcast %c0_i32_14 : i32 to vector<8x128xi32>
      %29 = arith.cmpi eq, %8, %28 : vector<8x128xi32>
      %c1_i32 = arith.constant 1 : i32
      %30 = vector.broadcast %c1_i32 : i32 to vector<8x128xi32>
      %31 = arith.cmpi eq, %8, %30 : vector<8x128xi32>
      %cst_15 = arith.constant 0.000000e+00 : f32
      %32 = vector.shape_cast %27 : vector<1x128xf32> to vector<1x128xf32>
      %33 = vector.broadcast %32 : vector<1x128xf32> to vector<8x128xf32>
      %34 = vector.broadcast %cst_15 : f32 to vector<8x128xf32>
      %35 = arith.select %31, %33, %34 : vector<8x128xi1>, vector<8x128xf32>
      %36 = vector.shape_cast %24 : vector<1x128xf32> to vector<1x128xf32>
      %37 = vector.broadcast %36 : vector<1x128xf32> to vector<8x128xf32>
      %38 = arith.select %29, %37, %35 : vector<8x128xi1>, vector<8x128xf32>
      %c0_16 = arith.constant 0 : index
      %c0_17 = arith.constant 0 : index
      %39 = vector.load %arg5[%c0_16, %c0_17] : memref<8x128xf32, #tpu.memory_space<vmem>>, vector<8x128xf32>
      tpu.vector_store %arg5[%c0_16, %c0_17], %38 {strides = array<i32>} : memref<8x128xf32, #tpu.memory_space<vmem>>, vector<8x128xf32>,
    } else {
    }
    return
  }
  func.func @transform_0(%arg0: i32) -> (i32, i32) {
    %c0_i32 = arith.constant 0 : i32
    %c0_i32_0 = arith.constant 0 : i32
    return %arg0, %c0_i32 : i32, i32
  }
  func.func @transform_1(%arg0: i32) -> (i32, i32) {
    %c0_i32 = arith.constant 0 : i32
    %c0_i32_0 = arith.constant 0 : i32
    %c0_i32_1 = arith.constant 0 : i32
    return %c0_i32, %c0_i32_0 : i32, i32
  }
  func.func @transform_2(%arg0: i32) -> (i32, i32) {
    %c0_i32 = arith.constant 0 : i32
    %c0_i32_0 = arith.constant 0 : i32
    %c0_i32_1 = arith.constant 0 : i32
    return %c0_i32, %c0_i32_0 : i32, i32
  }
  func.func @transform_3(%arg0: i32) -> (i32, i32) {
    %c0_i32 = arith.constant 0 : i32
    %c0_i32_0 = arith.constant 0 : i32
    return %arg0, %c0_i32 : i32, i32
  }
  func.func @transform_4(%arg0: i32) -> (i32, i32) {
    %c0_i32 = arith.constant 0 : i32
    %c0_i32_0 = arith.constant 0 : i32
    return %arg0, %c0_i32 : i32, i32
  }
}

</mosaic_0001>

<bundles_post_ra>
// kernel: resnet_stem_block.3
= control target key start
LH: loop header
LB: loop body
LE: loop exit
PB: predicated region body
PF: predicated region fallthrough
CT: control target
= control target key end

     0   :  { %s388_s12 = smov 0   ;;  %s430_s0 = inlined_call_operand.vmem [shape: bf16[128,128], index: 0, kind: input, shape index: {}]   ;;  %s431_s1 = inlined_call_operand.vmem [shape: f32[1,128], index: 1, kind: input, shape index: {}]   ;;  %s432_s2 = inlined_call_operand.vmem [shape: f32[1,128], index: 2, kind: input, shape index: {}]   ;;  %s433_s3 = inlined_call_operand.vmem [shape: f32[8,4,128], index: 3, kind: output, shape index: {}]  }
   0x1 LB: > { %s310_s13 = sadd.s32 4294967295, %s361_s12   ;;  %p314_p0 = scmp.ge.s32.totalorder %s361_s12, 1  ;;  %s361_s12 = sphi %s388_s12, %s13_s12  }
   0x2   : > { %p138_p1 = scmp.lt.s32.totalorder %s361_s12, 3 }
   0x4   : > { %p139_p2 = pnand %p314_p0, %p138_p1 }
   0x5   : > { %s315_s14 = sshll.u32 (!%p139_p2), %s310_s13, 3  ;;  %s317_s15 = sshll.u32 (!%p139_p2), %s310_s13, 2  ;;  %v321_v0 = vld [vmem:[%s431_s1] ss:$0 sm:$0xff] (!%p139_p2)  ;;  %v367_v1 = vmov (!%p139_p2), 0.0  }
   0x6   : > { %142 = sbr.rel (%p139_p2) target bundleno = 52 (0x34), region = 32  ;;  %p163_p3 = scmp.lt.s32.totalorder (!%p139_p2), %s315_s14, 15  ;;  %174 = vst [vmem:[#allocation2] sm:$0xff] (!%p139_p2), %v367_v1  ;;  %v322_v2 = vld [vmem:[%s432_s2] ss:$0 sm:$0xff] (!%p139_p2) }
   0x7   : > { %p169_p4 = scmp.lt.s32.totalorder (!%p139_p2), %s317_s15, 7  ;;  %s412_s28 = smov (!%p139_p2), 0  }
   0xd   : > { %s435_s14 = smov (!%p163_p3, %s315_s14), 15  ;;  %s437_s15 = smov (!%p169_p4, %s317_s15), 7 }
   0xe   : > { %s316_s20 = sshll.u32 %s435_s14, 2  ;;  %s318_s24 = sshll.u32 %s437_s15, 2 }
   0xf   : > { %s405_s23 = scalar_lea.vmem %s430_s0, %s316_s20  ;;  %s410_s27 = scalar_lea.vmem %s433_s3, %s318_s24 }
  0x10 LB: >> { %s319_s29 = sshll.u32 %s365_s28, 4  ;;  %s323_s30 = sshll.u32 %s365_s28, 1  ;;  %s365_s28 = sphi %s412_s28, %s182_s28  }
  0x11   : >> { %s184_s4 = sshra.s32 %s319_s29, 3  ;;  %s324_s5 = sadd.s32 4294967295, %s323_s30 }
  0x12   : >> { %s320_s6 = sshll.u32 %s184_s4, 2  ;;  %p212_p5 = scmp.gt.s32.totalorder %s324_s5, 0 }
  0x13   : >> { %s187_s7 = scalar_lea.vmem %s405_s23, %s320_s6  ;;  %p224_p6 = scmp.gt.s32.totalorder %s365_s28, 0 }
  0x14   : >> { %v331_v3 = vld [vmem:[%s187_s7] sm:$0xff]   ;;  %s439_s5 = smov (!%p212_p5, %s324_s5), 0  ;;  %s327_s15 = sshll.u32 %s365_s28, 2 }
  0x15   : >> { %v332_v4 = vunpack.c.l.bf16 %v331_v3  ;;  %v333_v5 = vunpack.c.h.bf16 %v331_v3  ;;  %s225_s8 = scalar_select %p224_p6, 1, 0 }
  0x16   : >> { %s325_s9 = sshll.u32 %s439_s5, 3  ;;  %s241_s16 = scalar_lea.vmem %s410_s27, %s327_s15 }
  0x17   : >> { %v198_v6 = vmul.f32 %v332_v4, %v321_v0  ;;  %v199_v7 = vmul.f32 %v333_v5, %v321_v0  ;;  %s215_s10 = sshra.s32 %s325_s9, 3  ;;  %s226_s14 = scvt.s32.f32 %s225_s8 }
  0x18   : >> { %s326_s11 = sshll.u32 %s215_s10, 2  ;;  %s182_s28 = sadd.s32 1, %s365_s28  }
  0x19   : >> { %v206_v8 = vadd.f32 %v322_v2, %v198_v6  ;;  %v207_v9 = vadd.f32 %v322_v2, %v199_v7  ;;  %s218_s13 = scalar_lea.vmem %s405_s23, %s326_s11  ;;  %v227_v16 = vstv %s226_s14  ;;  %p179_p7 = scmp.ge.s32.totalorder %s182_s28, 4  }
  0x1a   : >> { %v219_v10 = vld [vmem:[%s218_s13] sm:$0xf] }
  0x1b   : >> { %v220_v11 = vunpack.c.l.bf16 %v219_v10  ;;  %v208_v12 = vmax.f32 %v206_v8, 0.0  ;;  %v209_v13 = vmax.f32 %v207_v9, 0.0 }
  0x1d   : >> { %v221_v14 = vmul.f32 %v321_v0, %v220_v11  ;;  %v229_v18 = vmax.f32 %v208_v12, %v209_v13 }
  0x1f   : >> { %v222_v15 = vadd.f32 %v322_v2, %v221_v14 }
  0x21   : >> { %v223_v17 = vmax.f32 %v222_v15, 0.0 }
  0x23   : >> { %v228_v19 = vmul.f32 %v227_v16, %v223_v17 }
  0x25   : >> { %v230_v20 = vmax.f32 %v228_v19, %v229_v18 }
  0x27   : >> { %231 = vst [vmem:[#allocation2 + $0x8] sm:$0xff] %v230_v20 }
  0x2d   : > { %181 = sbr.rel (!%p179_p7) target bundleno = 16 (0x10), region = 75 }
  0x2e   : >> { %v235_v21 = vld [vmem:[#allocation2 + $0x8] ss:$2 sm:$0xf]  ;;  %v237_v22 = vld [vmem:[#allocation2 + $0x9] ss:$2 sm:$0xf] }
  0x2f   : >> { %v238_v23 = vmax.f32 %v235_v21, %v237_v22  ;;  %v233_v24 = vld [vmem:[#allocation2 + $0x7] ss:$2 sm:$0xf] }
  0x31   : >> { %v239_v25 = vmax.f32 %v233_v24, %v238_v23 }
  0x33   : >> { %242 = vst [vmem:[%s241_s16] sm:$0xf] %v239_v25 }
  0x34 PF: > { %s13_s12 = sadd.s32 1, %s361_s12  }
  0x35   : > { %p10_p8 = scmp.ge.s32.totalorder %s13_s12, 4  }
  0x37   :  { %12 = sbr.rel (!%p10_p8) target bundleno = 1 (0x1), region = 86 }

// kernel: resnet_stem_block.2
= control target key start
LH: loop header
LB: loop body
LE: loop exit
PB: predicated region body
PF: predicated region fallthrough
CT: control target
= control target key end

     0   :  { %v808_v0 = vmov 0   ;;  %vm212_vm0 = vcmask 588800   ;;  %vm237_vm1 = vcmask 1043456   ;;  %s1021_s1 = inlined_call_operand.vmem [shape: bf16[200,128], index: 1, kind: input, shape index: {}]   ;;  %s1022_s0 = inlined_call_operand.vmem [shape: bf16[128,200], index: 0, kind: input, shape index: {}]   ;;  %s1023_s2 = inlined_call_operand.vmem [shape: f32[1,128], index: 2, kind: input, shape index: {}]   ;;  %s1024_s3 = inlined_call_operand.vmem [shape: bf16[128,128], index: 3, kind: output, shape index: {0}]   ;;  %s1025_s4 = inlined_call_operand.vmem [shape: f32[8,128], index: 4, kind: output, shape index: {1}]  }
   0x1   :  { %241 = vmatprep.subr.bf16.mxu0 %v808_v0  ;;  %v771_v1 = vld [vmem:[%s1021_s1] sm:$0xff]   ;;  %744 = vmatprep.subr.bf16.mxu1 %v808_v0  ;;  %v772_v2 = vld [vmem:[%s1021_s1 + $0x8] sm:$0xff]   ;;  %v773_v3 = vld [vmem:[%s1021_s1 + $0x10] sm:$0xff]  }
   0x2   :  { %242 = vmatpush1.bf16.msra.mxu0 %v771_v1  ;;  %757 = vmatpush1.bf16.msra.mxu1 %v771_v1  ;;  %v774_v4 = vld [vmem:[%s1021_s1 + $0x18] sm:$0xff]   ;;  %v786_v5 = vld [vmem:[%s1022_s0 + $0x4] ss:$8 sps:$4 sm:$0xff]   ;;  %v777_v9 = vld [vmem:[%s1021_s1 + $0x30] sm:$0xff]  }
   0x3   :  { %243 = vmatprep.subr.bf16.mxu0 %v808_v0  ;;  %745 = vmatprep.subr.bf16.mxu1 %v808_v0  ;;  %v775_v6 = vld [vmem:[%s1021_s1 + $0x20] sm:$0xff]   ;;  %v776_v8 = vld [vmem:[%s1021_s1 + $0x28] sm:$0xff]   ;;  %v778_v10 = vld [vmem:[%s1021_s1 + $0x38] sm:$0xff]  }
   0x4   :  { %657 = vmatprep.mubr.msk.bf16.mxu0 %vm212_vm0, %v786_v5  ;;  %v792_v7 = vld [vmem:[%s1022_s0 + $0x44] ss:$8 sps:$4 sm:$0xff]   ;;  %v781_v13 = vld [vmem:[%s1021_s1 + $0x50] sm:$0xff]   ;;  %v782_v14 = vld [vmem:[%s1021_s1 + $0x58] sm:$0xff]  }
   0x5   :  { %661 = vmatprep.mubr.msk.bf16.mxu1 %vm212_vm0, %v792_v7  ;;  %v779_v11 = vld [vmem:[%s1021_s1 + $0x40] sm:$0xff]   ;;  %v780_v12 = vld [vmem:[%s1021_s1 + $0x48] sm:$0xff]   ;;  %v787_v19 = vld [vmem:[%s1022_s0 + $0x14] ss:$8 sps:$4 sm:$0xff]  }
   0x6   :  { %244 = vmatpush1.bf16.msra.mxu0 %v772_v2  ;;  %758 = vmatpush1.bf16.msra.mxu1 %v772_v2  ;;  %v783_v15 = vld [vmem:[%s1021_s1 + $0x60] ss:$0 sps:$4 sm:$0xff]   ;;  %v796_v20 = vld [vmem:[%s1022_s0 + $0x54] ss:$8 sps:$4 sm:$0xff]   ;;  %v789_v21 = vld [vmem:[%s1022_s0 + $0x10] ss:$8 sps:$4 sm:$0xff]  }
   0x7   :  { %245 = vmatprep.subr.bf16.mxu0 %v808_v0  ;;  %746 = vmatprep.subr.bf16.mxu1 %v808_v0  ;;  %v239_v16 = vsel %vm237_vm1, %v783_v15, 0  ;;  %v784_v17 = vld [vmem:[%s1022_s0] ss:$8 sps:$4 sm:$0xff]   ;;  %v798_v22 = vld [vmem:[%s1022_s0 + $0x50] ss:$8 sps:$4 sm:$0xff]  }
   0x8   :  { %v790_v18 = vld [vmem:[%s1022_s0 + $0x40] ss:$8 sps:$4 sm:$0xff]   ;;  %v793_v23 = vld [vmem:[%s1022_s0 + $0x24] ss:$8 sps:$4 sm:$0xff]   ;;  %v799_v27 = vld [vmem:[%s1022_s0 + $0x34] ss:$8 sps:$4 sm:$0xff]  }
   0x9   :  { %v802_v24 = vld [vmem:[%s1022_s0 + $0x64] ss:$8 sps:$4 sm:$0xff]   ;;  %v795_v25 = vld [vmem:[%s1022_s0 + $0x20] ss:$8 sps:$4 sm:$0xff]   ;;  %v805_v28 = vld [vmem:[%s1022_s0 + $0x74] ss:$8 sps:$4 sm:$0xff]  }
   0xa   :  { %246 = vmatpush1.bf16.msra.mxu0 %v773_v3  ;;  %759 = vmatpush1.bf16.msra.mxu1 %v773_v3  ;;  %v804_v26 = vld [vmem:[%s1022_s0 + $0x60] ss:$8 sps:$4 sm:$0xff]   ;;  %v801_v29 = vld [vmem:[%s1022_s0 + $0x30] ss:$8 sps:$4 sm:$0xff]  }
   0xb   :  { %247 = vmatprep.subr.bf16.mxu0 %v808_v0  ;;  %747 = vmatprep.subr.bf16.mxu1 %v808_v0  ;;  %v807_v30 = vld [vmem:[%s1022_s0 + $0x70] ss:$8 sps:$4 sm:$0xff]   ;;  %v958_v31 = vld [vmem:[%s1023_s2] ss:$0 sm:$0xff] }
   0xe   :  { %248 = vmatpush1.bf16.msra.mxu0 %v774_v4  ;;  %760 = vmatpush1.bf16.msra.mxu1 %v774_v4 }
   0xf   :  { %249 = vmatprep.subr.bf16.mxu0 %v808_v0  ;;  %748 = vmatprep.subr.bf16.mxu1 %v808_v0 }
  0x12   :  { %250 = vmatpush1.bf16.msra.mxu0 %v775_v6  ;;  %761 = vmatpush1.bf16.msra.mxu1 %v775_v6 }
  0x13   :  { %251 = vmatprep.subr.bf16.mxu0 %v808_v0  ;;  %749 = vmatprep.subr.bf16.mxu1 %v808_v0 }
  0x16   :  { %252 = vmatpush1.bf16.msra.mxu0 %v776_v8  ;;  %762 = vmatpush1.bf16.msra.mxu1 %v776_v8 }
  0x17   :  { %253 = vmatprep.subr.bf16.mxu0 %v808_v0  ;;  %750 = vmatprep.subr.bf16.mxu1 %v808_v0 }
  0x1a   :  { %254 = vmatpush1.bf16.msra.mxu0 %v777_v9  ;;  %763 = vmatpush1.bf16.msra.mxu1 %v777_v9 }
  0x1b   :  { %255 = vmatprep.subr.bf16.mxu0 %v808_v0  ;;  %751 = vmatprep.subr.bf16.mxu1 %v808_v0 }
  0x1e   :  { %256 = vmatpush1.bf16.msra.mxu0 %v778_v10  ;;  %764 = vmatpush1.bf16.msra.mxu1 %v778_v10 }
  0x1f   :  { %257 = vmatprep.subr.bf16.mxu0 %v808_v0  ;;  %752 = vmatprep.subr.bf16.mxu1 %v808_v0 }
  0x22   :  { %258 = vmatpush1.bf16.msra.mxu0 %v779_v11  ;;  %765 = vmatpush1.bf16.msra.mxu1 %v779_v11 }
  0x23   :  { %259 = vmatprep.subr.bf16.mxu0 %v808_v0  ;;  %753 = vmatprep.subr.bf16.mxu1 %v808_v0 }
  0x26   :  { %260 = vmatpush1.bf16.msra.mxu0 %v780_v12  ;;  %766 = vmatpush1.bf16.msra.mxu1 %v780_v12 }
  0x27   :  { %261 = vmatprep.subr.bf16.mxu0 %v808_v0  ;;  %754 = vmatprep.subr.bf16.mxu1 %v808_v0 }
  0x2a   :  { %262 = vmatpush1.bf16.msra.mxu0 %v781_v13  ;;  %767 = vmatpush1.bf16.msra.mxu1 %v781_v13 }
  0x2b   :  { %263 = vmatprep.subr.bf16.mxu0 %v808_v0  ;;  %755 = vmatprep.subr.bf16.mxu1 %v808_v0 }
  0x2e   :  { %264 = vmatpush1.bf16.msra.mxu0 %v782_v14  ;;  %768 = vmatpush1.bf16.msra.mxu1 %v782_v14 }
  0x2f   :  { %265 = vmatprep.subr.bf16.mxu0 %v808_v0  ;;  %756 = vmatprep.subr.bf16.mxu1 %v808_v0 }
  0x32   :  { %266 = vmatpush1.bf16.msra.mxu0 %v239_v16  ;;  %769 = vmatpush1.bf16.msra.mxu1 %v239_v16 }
  0x35   :  { %274 = vmatmul.mubr.bf16.vlgmr.msra.gmra.mrb[0].mxu0 %v784_v17  ;;  %306 = vmatmul.mubr.bf16.vlgmr.msra.gmra.mrb[0].mxu1 %v790_v18 }
  0x36   :  { %658 = vmatprep.mubr.msk.bf16.mxu0 %vm212_vm0, %v787_v19  ;;  %662 = vmatprep.mubr.msk.bf16.mxu1 %vm212_vm0, %v796_v20 }
  0x3d   :  { %282 = vmatmul.mubr.bf16.gmra.mrb[4].mxu0 %v789_v21  ;;  %314 = vmatmul.mubr.bf16.gmra.mrb[4].mxu1 %v798_v22 }
  0x3e   :  { %659 = vmatprep.mubr.msk.bf16.mxu0 %vm212_vm0, %v793_v23  ;;  %663 = vmatprep.mubr.msk.bf16.mxu1 %vm212_vm0, %v802_v24 }
  0x45   :  { %290 = vmatmul.mubr.bf16.gmra.mrb[8].mxu0 %v795_v25  ;;  %322 = vmatmul.mubr.bf16.gmra.mrb[8].mxu1 %v804_v26 }
  0x46   :  { %660 = vmatprep.mubr.msk.bf16.mxu0 %vm212_vm0, %v799_v27  ;;  %664 = vmatprep.mubr.msk.bf16.mxu1 %vm212_vm0, %v805_v28 }
  0x4d   :  { %298 = vmatmul.mubr.bf16.gmra.mrb[12].mxu0 %v801_v29  ;;  %330 = vmatmul.mubr.bf16.gmra.mrb[12].mxu1 %v807_v30 }
 0x108   :  { %v275_v32 = vpop.f32.mrb[0].mxu0  ;;  %v307_v33 = vpop.f32.mrb[0].mxu1 }
 0x109   :  { %v276_v34 = vadd.f32 %v958_v31, %v275_v32  ;;  %v277_v35 = vpop.f32.mrb[1].mxu0  ;;  %v962_v36 = vadd.f32 %v958_v31, %v307_v33  ;;  %v309_v37 = vpop.f32.mrb[1].mxu1 }
 0x10a   :  { %v278_v38 = vpop.f32.mrb[2].mxu0  ;;  %v310_v39 = vpop.f32.mrb[2].mxu1 }
 0x10b   :  { %v279_v40 = vadd.f32 %v958_v31, %v278_v38  ;;  %v280_v41 = vpop.f32.mrb[3].mxu0  ;;  %v966_v42 = vadd.f32 %v958_v31, %v310_v39  ;;  %v312_v43 = vpop.f32.mrb[3].mxu1  ;;  %v577_v44 = vmul.f32 %v276_v34, %v276_v34 }
 0x10d   :  { %v700_v45 = vpack.c.bf16 %v279_v40, %v276_v34  ;;  %v556_v46 = vadd.f32 %v279_v40, %v276_v34  ;;  %v578_v47 = vmul.f32 %v279_v40, %v279_v40  ;;  %v720_v48 = vpack.c.bf16 %v966_v42, %v962_v36 }
 0x10f   :  { %701 = vst [vmem:[%s1024_s3] sm:$0xff] %v700_v45   ;;  %v593_v49 = vadd.f32 %v578_v47, %v577_v44  ;;  %740 = vst [vmem:[%s1024_s3 + $0x20] sm:$0xff] %v720_v48   ;;  %v585_v48 = vmul.f32 %v962_v36, %v962_v36 }
 0x110   :  { %v283_v50 = vpop.f32.mrb[4].mxu0  ;;  %v315_v51 = vpop.f32.mrb[4].mxu1 }
 0x111   :  { %v284_v52 = vadd.f32 %v958_v31, %v283_v50  ;;  %v285_v53 = vpop.f32.mrb[5].mxu0  ;;  %v317_v54 = vpop.f32.mrb[5].mxu1  ;;  %v978_v56 = vadd.f32 %v958_v31, %v315_v51 }
 0x112   :  { %v286_v55 = vpop.f32.mrb[6].mxu0  ;;  %v318_v57 = vpop.f32.mrb[6].mxu1 }
 0x113   :  { %v557_v58 = vadd.f32 %v556_v46, %v284_v52  ;;  %v579_v59 = vmul.f32 %v284_v52, %v284_v52  ;;  %v287_v60 = vadd.f32 %v958_v31, %v286_v55  ;;  %v288_v61 = vpop.f32.mrb[7].mxu0  ;;  %v320_v62 = vpop.f32.mrb[7].mxu1  ;;  %v319_v63 = vadd.f32 %v958_v31, %v318_v57 }
 0x114   :  { %v587_v53 = vmul.f32 %v978_v56, %v978_v56 }
 0x115   :  { %v594_v0 = vadd.f32 %v593_v49, %v579_v59  ;;  %v705_v1 = vpack.c.bf16 %v287_v60, %v284_v52  ;;  %v558_v2 = vadd.f32 %v557_v58, %v287_v60  ;;  %v580_v3 = vmul.f32 %v287_v60, %v287_v60 }
 0x116   :  { %v725_v4 = vpack.c.bf16 %v319_v63, %v978_v56  ;;  %v588_v57 = vmul.f32 %v319_v63, %v319_v63 }
 0x117   :  { %737 = vst [vmem:[%s1024_s3 + $0x8] sm:$0xff] %v705_v1   ;;  %v595_v5 = vadd.f32 %v594_v0, %v580_v3 }
 0x118   :  { %v291_v6 = vpop.f32.mrb[8].mxu0  ;;  %741 = vst [vmem:[%s1024_s3 + $0x28] sm:$0xff] %v725_v4   ;;  %v323_v7 = vpop.f32.mrb[8].mxu1 }
 0x119   :  { %v292_v8 = vadd.f32 %v958_v31, %v291_v6  ;;  %v293_v9 = vpop.f32.mrb[9].mxu0  ;;  %v325_v10 = vpop.f32.mrb[9].mxu1  ;;  %v324_v12 = vadd.f32 %v958_v31, %v323_v7 }
 0x11a   :  { %v294_v11 = vpop.f32.mrb[10].mxu0  ;;  %v326_v13 = vpop.f32.mrb[10].mxu1 }
 0x11b   :  { %v559_v14 = vadd.f32 %v558_v2, %v292_v8  ;;  %v581_v15 = vmul.f32 %v292_v8, %v292_v8  ;;  %v295_v16 = vadd.f32 %v958_v31, %v294_v11  ;;  %v296_v17 = vpop.f32.mrb[11].mxu0  ;;  %v328_v18 = vpop.f32.mrb[11].mxu1  ;;  %v327_v19 = vadd.f32 %v958_v31, %v326_v13 }
 0x11c   :  { %v589_v60 = vmul.f32 %v324_v12, %v324_v12 }
 0x11d   :  { %v596_v20 = vadd.f32 %v595_v5, %v581_v15  ;;  %v710_v21 = vpack.c.bf16 %v295_v16, %v292_v8  ;;  %v560_v22 = vadd.f32 %v559_v14, %v295_v16  ;;  %v582_v23 = vmul.f32 %v295_v16, %v295_v16 }
 0x11e   :  { %v730_v24 = vpack.c.bf16 %v327_v19, %v324_v12  ;;  %v590_v1 = vmul.f32 %v327_v19, %v327_v19 }
 0x11f   :  { %738 = vst [vmem:[%s1024_s3 + $0x10] sm:$0xff] %v710_v21   ;;  %v597_v25 = vadd.f32 %v596_v20, %v582_v23 }
 0x120   :  { %v299_v26 = vpop.f32.mrb[12].mxu0  ;;  %742 = vst [vmem:[%s1024_s3 + $0x30] sm:$0xff] %v730_v24   ;;  %v331_v27 = vpop.f32.mrb[12].mxu1 }
 0x121   :  { %v300_v28 = vadd.f32 %v958_v31, %v299_v26  ;;  %v301_v29 = vpop.f32.mrb[13].mxu0  ;;  %v333_v30 = vpop.f32.mrb[13].mxu1  ;;  %v332_v33 = vadd.f32 %v958_v31, %v331_v27 }
 0x122   :  { %v302_v32 = vpop.f32.mrb[14].mxu0  ;;  %v334_v34 = vpop.f32.mrb[14].mxu1 }
 0x123   :  { %v561_v35 = vadd.f32 %v560_v22, %v300_v28  ;;  %v583_v37 = vmul.f32 %v300_v28, %v300_v28  ;;  %v303_v38 = vadd.f32 %v958_v31, %v302_v32  ;;  %v304_v39 = vpop.f32.mrb[15].mxu0  ;;  %v336_v40 = vpop.f32.mrb[15].mxu1  ;;  %v335_v41 = vadd.f32 %v958_v31, %v334_v34 }
 0x124   :  { %v586_v31 = vmul.f32 %v966_v42, %v966_v42  ;;  %v591_v2 = vmul.f32 %v332_v33, %v332_v33 }
 0x125   :  { %v598_v43 = vadd.f32 %v597_v25, %v583_v37  ;;  %v715_v44 = vpack.c.bf16 %v303_v38, %v300_v28  ;;  %v562_v45 = vadd.f32 %v561_v35, %v303_v38  ;;  %v584_v46 = vmul.f32 %v303_v38, %v303_v38 }
 0x126   :  { %v735_v47 = vpack.c.bf16 %v335_v41, %v332_v33  ;;  %v592_v6 = vmul.f32 %v335_v41, %v335_v41 }
 0x127   :  { %739 = vst [vmem:[%s1024_s3 + $0x18] sm:$0xff] %v715_v44   ;;  %v563_v49 = vadd.f32 %v562_v45, %v962_v36  ;;  %v599_v50 = vadd.f32 %v598_v43, %v584_v46 }
 0x128   :  { %743 = vst [vmem:[%s1024_s3 + $0x38] sm:$0xff] %v735_v47  }
 0x129   :  { %v564_v51 = vadd.f32 %v563_v49, %v966_v42  ;;  %v600_v52 = vadd.f32 %v599_v50, %v585_v48 }
 0x12b   :  { %v601_v54 = vadd.f32 %v600_v52, %v586_v31  ;;  %v565_v55 = vadd.f32 %v564_v51, %v978_v56  ;;  %v418_v56 = vlaneseq }
 0x12d   :  { %v566_v58 = vadd.f32 %v565_v55, %v319_v63  ;;  %v602_v36 = vadd.f32 %v601_v54, %v587_v53 }
 0x12f   :  { %v567_v59 = vadd.f32 %v566_v58, %v324_v12  ;;  %v603_v61 = vadd.f32 %v602_v36, %v588_v57  ;;  %v419_v12 = vshrl.u32 %v418_v56, 7 }
 0x131   :  { %v604_v62 = vadd.f32 %v603_v61, %v589_v60  ;;  %v568_v0 = vadd.f32 %v567_v59, %v327_v19  ;;  %vm615_vm2 = vcmp.eq.s32.totalorder %v419_v12, 1  ;;  %vm614_vm3 = vcmp.eq.s32.totalorder %v419_v12, 0 }
 0x133   :  { %v605_v3 = vadd.f32 %v604_v62, %v590_v1  ;;  %v569_v4 = vadd.f32 %v568_v0, %v332_v33 }
 0x135   :  { %v606_v42 = vadd.f32 %v605_v3, %v591_v2  ;;  %v570_v5 = vadd.f32 %v569_v4, %v335_v41 }
 0x137   :  { %v571_v7 = vrot.slane %v570_v5, 4  ;;  %v607_v8 = vadd.f32 %v606_v42, %v592_v6 }
 0x139   :  { %v572_v9 = vadd.f32 %v571_v7, %v570_v5  ;;  %v608_v10 = vrot.slane %v607_v8, 4 }
 0x13b   :  { %v573_v11 = vrot.slane %v572_v9, 2  ;;  %v609_v63 = vadd.f32 %v608_v10, %v607_v8 }
 0x13d   :  { %v574_v13 = vadd.f32 %v573_v11, %v572_v9  ;;  %v610_v14 = vrot.slane %v609_v63, 2 }
 0x13f   :  { %v611_v15 = vadd.f32 %v610_v14, %v609_v63  ;;  %v575_v16 = vrot.slane %v574_v13, 1 }
 0x141   :  { %v612_v17 = vrot.slane %v611_v15, 1  ;;  %v576_v19 = vadd.f32 %v575_v16, %v574_v13 }
 0x143   :  { %v613_v18 = vadd.f32 %v612_v17, %v611_v15 }
 0x145   :  { %v616_v20 = vsel %vm615_vm2, %v613_v18, 0.0 }
 0x146   :  { %v617_v21 = vsel %vm614_vm3, %v576_v19, %v616_v20 }
 0x147   :  { %618 = vst [vmem:[%s1025_s4] sm:$0xff] %v617_v21 }

</bundles_post_ra>
